<compile_context>
chip_gen: v5e
topology: v5e:2x2
jax: 0.10.0
libtpu: 0.0.40
codegen_flags: <defaults>
</compile_context>

<pallas_src>
import functools

import jax
import jax.numpy as jnp
from jax.experimental import pallas as pl
from jax.experimental.pallas import tpu as pltpu

_MIB = 1024 * 1024


def _round_up(v, m):
    return (v + m - 1) // m * m


def _cdiv(a, b):
    return -(-a // b)


def _vmem_capacity_bytes():
    try:
        info = pltpu.get_tpu_info()
        cap = getattr(info, "vmem_capacity_bytes", None)
        if cap:
            return int(cap)
    except Exception:
        pass
    return 64 * _MIB  # conservative (v7x-sized) fallback if the query fails


def _vmem_budget_and_limit():
    cap = _vmem_capacity_bytes()
    if cap <= 64 * _MIB:
        # v7x: 64 MiB VMEM per TC -> small blocks; HBM is fast enough that the
        # mem-bound roofline is reached at modest block sizes anyway.
        return 16 * _MIB, 40 * _MIB
    # v5e / v6e: 128 MiB physical VMEM; larger blocks amortize per-step cost.
    # TODO(synk): on v5e prefer a deeper pipeline (pl.Buffered(3)) over ever
    # larger blocks once the per-step DMA exceeds a few microseconds.
    return 40 * _MIB, 96 * _MIB


# ----------------------------------------------------------------------------
# Fused single-pass kernel (normal H*W): whole row resident in the block.
# ----------------------------------------------------------------------------
def _adain_fused_kernel(x_ref, y_ref, o_ref, *, eps, hw_x, hw_y):
    inv_hw_x = 1.0 / hw_x
    inv_hw_y = 1.0 / hw_y

    # --- Style statistics from y (pivoted single pass, f32 accumulation). ---
    y0 = y_ref[:, 0:1].astype(jnp.float32)            # per-row pivot
    yc = y_ref[...].astype(jnp.float32) - y0
    sum_yc = jnp.sum(yc, axis=-1, keepdims=True)
    sumsq_yc = jnp.sum(yc * yc, axis=-1, keepdims=True)
    mean_yc = sum_yc * inv_hw_y
    # Unbiased (Bessel-corrected) variance, matching torch.Tensor.std().
    var_y = jnp.maximum(sumsq_yc - sum_yc * mean_yc, 0.0) * (1.0 / (hw_y - 1))
    sd_y = jnp.sqrt(var_y)
    mu_y = y0 + mean_yc

    # --- Content statistics from x (biased variance, like instance_norm). ---
    x0 = x_ref[:, 0:1].astype(jnp.float32)
    xc = x_ref[...].astype(jnp.float32) - x0
    sum_xc = jnp.sum(xc, axis=-1, keepdims=True)
    sumsq_xc = jnp.sum(xc * xc, axis=-1, keepdims=True)
    mean_xc = sum_xc * inv_hw_x
    var_x = jnp.maximum(sumsq_xc * inv_hw_x - mean_xc * mean_xc, 0.0)
    mu_x = x0 + mean_xc

    # --- Fused affine epilogue: out = x * scale + bias. ---------------------
    scale = sd_y * jax.lax.rsqrt(var_x + eps)          # rsqrt/sqrt -> EUP slot
    bias = mu_y - mu_x * scale
    # Re-read x from the ref so the centered f32 temp above is not kept live
    # across the epilogue (shorter live range -> lower vreg/VMEM pressure).
    o_ref[...] = (x_ref[...].astype(jnp.float32) * scale + bias).astype(o_ref.dtype)


def _adain_fused(x2, y2, out_dtype, rows, hw_x, hw_y, eps, rblk, vmem_limit,
                 itemsize_x, itemsize_y, donate_x):
    r_steps = _cdiv(rows, rblk)
    kernel = functools.partial(
        _adain_fused_kernel, eps=float(eps), hw_x=hw_x, hw_y=hw_y)
    return pl.pallas_call(
        kernel,
        out_shape=jax.ShapeDtypeStruct((rows, hw_x), out_dtype),
        grid_spec=pltpu.PrefetchScalarGridSpec(
            num_scalar_prefetch=0,
            grid=(r_steps,),
            in_specs=[
                pl.BlockSpec((rblk, hw_x), lambda r: (r, 0)),
                pl.BlockSpec((rblk, hw_y), lambda r: (r, 0)),
            ],
            out_specs=pl.BlockSpec((rblk, hw_x), lambda r: (r, 0)),
        ),
        compiler_params=pltpu.CompilerParams(
            dimension_semantics=("parallel",),
            vmem_limit_bytes=vmem_limit,
        ),
        cost_estimate=pl.CostEstimate(
            flops=rows * (4 * hw_x + 3 * hw_y),
            transcendentals=2 * rows,
            bytes_accessed=rows * (2 * hw_x * itemsize_x + hw_y * itemsize_y),
        ),
        input_output_aliases={0: 0} if donate_x else {},
    )(x2, y2)


# ----------------------------------------------------------------------------
# Two-level reduction fallback (very large H*W): pass 1 chunked stats,
# pass 2 chunked affine.  x is re-read in pass 2 instead of being VMEM-resident.
# ----------------------------------------------------------------------------
def _adain_stats_kernel(x_ref, y_ref, scale_ref, bias_ref,
                        sx, sxx, sy, syy, px, py,
                        *, eps, hw_x, hw_y, cx, cy, kx_n, ky_n):
    k = pl.program_id(1)

    @pl.when(k == 0)
    def _init():
        px[...] = x_ref[:, 0:1].astype(jnp.float32)    # per-row pivots
        py[...] = y_ref[:, 0:1].astype(jnp.float32)
        sx[...] = jnp.zeros_like(sx)
        sxx[...] = jnp.zeros_like(sxx)
        sy[...] = jnp.zeros_like(sy)
        syy[...] = jnp.zeros_like(syy)

    # x chunk contribution: mask pad lanes and chunks past this input's extent.
    kx = jnp.minimum(k, kx_n - 1)
    lane_x = jax.lax.broadcasted_iota(jnp.int32, x_ref.shape, 1)
    valid_x = jnp.logical_and(k < kx_n, kx * cx + lane_x < hw_x)
    xv = jnp.where(valid_x, x_ref[...].astype(jnp.float32) - px[...], 0.0)
    sx[...] = sx[...] + jnp.sum(xv, axis=-1, keepdims=True)
    sxx[...] = sxx[...] + jnp.sum(xv * xv, axis=-1, keepdims=True)

    # y chunk contribution.
    ky = jnp.minimum(k, ky_n - 1)
    lane_y = jax.lax.broadcasted_iota(jnp.int32, y_ref.shape, 1)
    valid_y = jnp.logical_and(k < ky_n, ky * cy + lane_y < hw_y)
    yv = jnp.where(valid_y, y_ref[...].astype(jnp.float32) - py[...], 0.0)
    sy[...] = sy[...] + jnp.sum(yv, axis=-1, keepdims=True)
    syy[...] = syy[...] + jnp.sum(yv * yv, axis=-1, keepdims=True)

    @pl.when(k == pl.num_programs(1) - 1)
    def _finalize():
        mean_yc = sy[...] * (1.0 / hw_y)
        var_y = jnp.maximum(syy[...] - sy[...] * mean_yc, 0.0) * (1.0 / (hw_y - 1))
        sd_y = jnp.sqrt(var_y)
        mu_y = py[...] + mean_yc

        mean_xc = sx[...] * (1.0 / hw_x)
        var_x = jnp.maximum(sxx[...] * (1.0 / hw_x) - mean_xc * mean_xc, 0.0)
        mu_x = px[...] + mean_xc

        scale = sd_y * jax.lax.rsqrt(var_x + eps)
        scale_ref[...] = scale
        bias_ref[...] = mu_y - mu_x * scale


def _adain_apply_kernel(x_ref, scale_ref, bias_ref, o_ref):
    o_ref[...] = (x_ref[...].astype(jnp.float32) * scale_ref[...]
                  + bias_ref[...]).astype(o_ref.dtype)


def _adain_two_pass(x2, y2, out_dtype, rows, hw_x, hw_y, eps, budget,
                    vmem_limit, itemsize_x, itemsize_y, sublane_align):
    rblk = sublane_align
    r_steps = _cdiv(rows, rblk)
    f32_extra = 4 if min(itemsize_x, itemsize_y) < 4 else 0

    # --- Pass 1: chunked stats reduction -> per-row scale / bias. -----------
    per_lane = rblk * (2 * (itemsize_x + itemsize_y) + 2 * f32_extra)
    c = max(128, (budget // per_lane) // 128 * 128)
    cx = min(c, _round_up(hw_x, 128))
    cy = min(c, _round_up(hw_y, 128))
    kx_n = _cdiv(hw_x, cx)
    ky_n = _cdiv(hw_y, cy)
    k_steps = max(kx_n, ky_n)

    stats_kernel = functools.partial(
        _adain_stats_kernel, eps=float(eps), hw_x=hw_x, hw_y=hw_y,
        cx=cx, cy=cy, kx_n=kx_n, ky_n=ky_n)

    scale, bias = pl.pallas_call(
        stats_kernel,
        out_shape=(jax.ShapeDtypeStruct((rows, 1), jnp.float32),
                   jax.ShapeDtypeStruct((rows, 1), jnp.float32)),
        grid_spec=pltpu.PrefetchScalarGridSpec(
            num_scalar_prefetch=0,
            grid=(r_steps, k_steps),
            in_specs=[
                pl.BlockSpec((rblk, cx),
                             lambda r, k, n=kx_n: (r, jnp.minimum(k, n - 1))),
                pl.BlockSpec((rblk, cy),
                             lambda r, k, n=ky_n: (r, jnp.minimum(k, n - 1))),
            ],
            out_specs=(
                pl.BlockSpec((rblk, 1), lambda r, k: (r, 0)),
                pl.BlockSpec((rblk, 1), lambda r, k: (r, 0)),
            ),
            scratch_shapes=[pltpu.VMEM((rblk, 1), jnp.float32)] * 6,
        ),
        compiler_params=pltpu.CompilerParams(
            dimension_semantics=("parallel", "arbitrary"),
            vmem_limit_bytes=vmem_limit,
        ),
        cost_estimate=pl.CostEstimate(
            flops=4 * rows * (hw_x + hw_y),
            transcendentals=2 * rows,
            bytes_accessed=rows * (hw_x * itemsize_x + hw_y * itemsize_y),
        ),
    )(x2, y2)

    # --- Pass 2: chunked elementwise out = x * scale + bias. ----------------
    per_lane2 = rblk * (4 * itemsize_x + f32_extra)
    c2 = max(128, (budget // per_lane2) // 128 * 128)
    cx2 = min(c2, _round_up(hw_x, 128))
    k2_steps = _cdiv(hw_x, cx2)

    out2 = pl.pallas_call(
        _adain_apply_kernel,
        out_shape=jax.ShapeDtypeStruct((rows, hw_x), out_dtype),
        grid_spec=pltpu.PrefetchScalarGridSpec(
            num_scalar_prefetch=0,
            grid=(r_steps, k2_steps),
            in_specs=[
                pl.BlockSpec((rblk, cx2), lambda r, k: (r, k)),
                pl.BlockSpec((rblk, 1), lambda r, k: (r, 0)),
                pl.BlockSpec((rblk, 1), lambda r, k: (r, 0)),
            ],
            out_specs=pl.BlockSpec((rblk, cx2), lambda r, k: (r, k)),
        ),
        compiler_params=pltpu.CompilerParams(
            dimension_semantics=("parallel", "parallel"),
            vmem_limit_bytes=vmem_limit,
        ),
        cost_estimate=pl.CostEstimate(
            flops=2 * rows * hw_x,
            transcendentals=0,
            bytes_accessed=2 * rows * hw_x * itemsize_x,
        ),
    )(x2, scale, bias)
    return out2


# ----------------------------------------------------------------------------
# Public wrapper.
# ----------------------------------------------------------------------------
def adain(x, y, eps=1e-5, *, vmem_budget_bytes=None, donate_x=False):
    """AdaIN forward. x, y are NCHW; returns x's shape/dtype."""
    N, C, H, W = x.shape
    Ny, Cy, Hy, Wy = y.shape
    assert N == Ny and C == Cy, "batch / channel dims of x and y must match"

    hw_x = H * W
    hw_y = Hy * Wy
    assert hw_y > 1, "y needs > 1 spatial element (unbiased std, like torch)"

    rows = N * C
    x2 = x.reshape(rows, hw_x)
    y2 = y.reshape(rows, hw_y)

    itemsize_x = jnp.dtype(x.dtype).itemsize
    itemsize_y = jnp.dtype(y.dtype).itemsize
    # Dtype-aware sublane alignment: 8 rows for f32, 16 for bf16, 32 for int8.
    sublane_align = 8 * (4 // min(itemsize_x, itemsize_y, 4))

    auto_budget, vmem_limit = _vmem_budget_and_limit()
    budget = auto_budget if vmem_budget_bytes is None else int(vmem_budget_bytes)

    # VMEM model per block row: double-buffered DMA windows for x, out and y
    # (lane-padded to the 128-lane tile inside VMEM) plus the single live f32
    # upcast temporary for sub-32-bit inputs.
    hw_x_pad = _round_up(hw_x, 128)
    hw_y_pad = _round_up(hw_y, 128)
    f32_tmp = 4 * max(hw_x_pad, hw_y_pad) if min(itemsize_x, itemsize_y) < 4 else 0
    bytes_per_row = 2 * (2 * hw_x_pad * itemsize_x + hw_y_pad * itemsize_y) + f32_tmp

    if bytes_per_row * sublane_align > budget:
        # Very large H*W: even a minimum-height row block does not fit -> use
        # the two-level (chunked) reduction so we stay at the HBM roofline.
        out2 = _adain_two_pass(x2, y2, x.dtype, rows, hw_x, hw_y, eps,
                               budget, vmem_limit, itemsize_x, itemsize_y,
                               sublane_align)
        return out2.reshape(N, C, H, W)

    # Row-block sizing: biggest aligned block under the budget, but keep at
    # least 2-4 grid steps when there is enough data so both v7x TensorCores
    # (and the DMA pipeline) have balanced work.
    rblk = (budget // bytes_per_row) // sublane_align * sublane_align
    rblk = max(sublane_align, min(rblk, _round_up(rows, sublane_align)))
    if rows >= 4 * sublane_align:
        min_steps = 4
    elif rows >= 2 * sublane_align:
        min_steps = 2
    else:
        min_steps = 1
    if min_steps > 1:
        rblk = min(rblk, _round_up(_cdiv(rows, min_steps), sublane_align))
    rblk = max(sublane_align, rblk)

    out2 = _adain_fused(x2, y2, x.dtype, rows, hw_x, hw_y, eps, rblk,
                        vmem_limit, itemsize_x, itemsize_y, donate_x)
    return out2.reshape(N, C, H, W)


def _adain_ref(x, y, eps=1e-5):
    """Pure-JAX reference mirroring the PyTorch module."""
    N, C, H, W = x.shape
    yf = y.reshape(N, C, -1).astype(jnp.float32)
    mu = jnp.mean(yf, axis=-1)
    sd = jnp.std(yf, axis=-1, ddof=1)          # torch .std() is unbiased
    xf = x.astype(jnp.float32)
    mx = jnp.mean(xf, axis=(2, 3), keepdims=True)
    vx = jnp.var(xf, axis=(2, 3), keepdims=True)   # biased, like instance_norm
    xn = (xf - mx) / jnp.sqrt(vx + eps)
    out = xn * sd[:, :, None, None] + mu[:, :, None, None]
    return out.astype(x.dtype)


if __name__ == "__main__":
    key = jax.random.PRNGKey(0)
    kx, ky, kx2, ky2 = jax.random.split(key, 4)

    # Primary shape: lane-aligned 16x16 spatial.
    N, C, H, W = 2, 4, 16, 16
    x = jax.random.normal(kx, (N, C, H, W), dtype=jnp.float32) * 2.0 + 0.5
    y = jax.random.normal(ky, (N, C, H, W), dtype=jnp.float32) * 3.0 - 1.0
    out = jax.block_until_ready(adain(x, y, eps=1e-5))
    ref = _adain_ref(x, y, eps=1e-5)
    assert out.shape == (N, C, H, W)
    assert jnp.allclose(out, ref, atol=1e-3, rtol=1e-3), "fused path mismatch"

    # Unaligned spatial extents (no wrapper padding, masked tail stores),
    # x/y with different spatial sizes, rows not a multiple of the row block.
    xb = jax.random.normal(kx2, (2, 3, 9, 9), dtype=jnp.float32) * 1.5 - 0.3
    yb = jax.random.normal(ky2, (2, 3, 7, 7), dtype=jnp.float32) * 0.7 + 2.0
    outb = jax.block_until_ready(adain(xb, yb, eps=1e-5))
    refb = _adain_ref(xb, yb, eps=1e-5)
    assert jnp.allclose(outb, refb, atol=1e-3, rtol=1e-3), "unaligned mismatch"

    # Force the large-H*W two-level reduction path with a tiny budget.
    xc = jax.random.normal(kx, (1, 2, 40, 40), dtype=jnp.float32) + 1.0
    yc = jax.random.normal(ky, (1, 2, 24, 24), dtype=jnp.float32) * 2.0
    outc = jax.block_until_ready(
        adain(xc, yc, eps=1e-5, vmem_budget_bytes=64 * 1024))
    refc = _adain_ref(xc, yc, eps=1e-5)
    assert jnp.allclose(outc, refc, atol=1e-3, rtol=1e-3), "two-pass mismatch"

    print("KERNEL_OK")
</pallas_src>

<mosaic_0001>
module attributes {stable_mosaic.version = 11 : i64} {
  func.func @_adain_fused_kernel(%arg0: i32, %arg1: memref<8x256xf32, #tpu.memory_space<vmem>>, %arg2: memref<8x256xf32, #tpu.memory_space<vmem>>, %arg3: memref<8x256xf32, #tpu.memory_space<vmem>>) attributes {dimension_semantics = [#tpu.dimension_semantics<parallel>], iteration_bounds = array<i64: 1>, scalar_prefetch = 0 : i64, scratch_operands = 0 : i64, tpu.core_type = #tpu.core_type<tc>, window_params = [{transform_indices = @transform_0, window_bounds = array<i64: 8, 256>}, {transform_indices = @transform_1, window_bounds = array<i64: 8, 256>}, {transform_indices = @transform_2, window_bounds = array<i64: 8, 256>}]} {
    %c0 = arith.constant 0 : index
    %c0_0 = arith.constant 0 : index
    %0 = vector.load %arg2[%c0, %c0_0] : memref<8x256xf32, #tpu.memory_space<vmem>>, vector<8x1xf32>
    %c0_1 = arith.constant 0 : index
    %c0_2 = arith.constant 0 : index
    %1 = vector.load %arg2[%c0_1, %c0_2] : memref<8x256xf32, #tpu.memory_space<vmem>>, vector<8x256xf32>
    %2 = vector.broadcast %0 : vector<8x1xf32> to vector<8x256xf32>
    %3 = arith.subf %1, %2 : vector<8x256xf32>
    %cst = arith.constant dense<0.000000e+00> : vector<8xf32>
    %4 = vector.multi_reduction <add>, %3, %cst [1] : vector<8x256xf32> to vector<8xf32>
    %5 = vector.shape_cast %4 : vector<8xf32> to vector<8x1xf32>
    %6 = arith.mulf %3, %3 : vector<8x256xf32>
    %cst_3 = arith.constant dense<0.000000e+00> : vector<8xf32>
    %7 = vector.multi_reduction <add>, %6, %cst_3 [1] : vector<8x256xf32> to vector<8xf32>
    %8 = vector.shape_cast %7 : vector<8xf32> to vector<8x1xf32>
    %cst_4 = arith.constant 3.906250e-03 : f32
    %9 = vector.broadcast %cst_4 : f32 to vector<8x1xf32>
    %10 = arith.mulf %5, %9 : vector<8x1xf32>
    %11 = arith.mulf %5, %10 : vector<8x1xf32>
    %12 = arith.subf %8, %11 : vector<8x1xf32>
    %cst_5 = arith.constant 0.000000e+00 : f32
    %13 = vector.broadcast %cst_5 : f32 to vector<8x1xf32>
    %14 = arith.maximumf %12, %13 : vector<8x1xf32>
    %cst_6 = arith.constant 0.00392156886 : f32
    %15 = vector.broadcast %cst_6 : f32 to vector<8x1xf32>
    %16 = arith.mulf %14, %15 : vector<8x1xf32>
    %17 = math.sqrt %16 : vector<8x1xf32>
    %18 = arith.addf %0, %10 : vector<8x1xf32>
    %c0_7 = arith.constant 0 : index
    %c0_8 = arith.constant 0 : index
    %19 = vector.load %arg1[%c0_7, %c0_8] : memref<8x256xf32, #tpu.memory_space<vmem>>, vector<8x1xf32>
    %c0_9 = arith.constant 0 : index
    %c0_10 = arith.constant 0 : index
    %20 = vector.load %arg1[%c0_9, %c0_10] : memref<8x256xf32, #tpu.memory_space<vmem>>, vector<8x256xf32>
    %21 = vector.broadcast %19 : vector<8x1xf32> to vector<8x256xf32>
    %22 = arith.subf %20, %21 : vector<8x256xf32>
    %cst_11 = arith.constant dense<0.000000e+00> : vector<8xf32>
    %23 = vector.multi_reduction <add>, %22, %cst_11 [1] : vector<8x256xf32> to vector<8xf32>
    %24 = vector.shape_cast %23 : vector<8xf32> to vector<8x1xf32>
    %25 = arith.mulf %22, %22 : vector<8x256xf32>
    %cst_12 = arith.constant dense<0.000000e+00> : vector<8xf32>
    %26 = vector.multi_reduction <add>, %25, %cst_12 [1] : vector<8x256xf32> to vector<8xf32>
    %27 = vector.shape_cast %26 : vector<8xf32> to vector<8x1xf32>
    %cst_13 = arith.constant 3.906250e-03 : f32
    %28 = vector.broadcast %cst_13 : f32 to vector<8x1xf32>
    %29 = arith.mulf %24, %28 : vector<8x1xf32>
    %cst_14 = arith.constant 3.906250e-03 : f32
    %30 = vector.broadcast %cst_14 : f32 to vector<8x1xf32>
    %31 = arith.mulf %27, %30 : vector<8x1xf32>
    %32 = arith.mulf %29, %29 : vector<8x1xf32>
    %33 = arith.subf %31, %32 : vector<8x1xf32>
    %cst_15 = arith.constant 0.000000e+00 : f32
    %34 = vector.broadcast %cst_15 : f32 to vector<8x1xf32>
    %35 = arith.maximumf %33, %34 : vector<8x1xf32>
    %36 = arith.addf %19, %29 : vector<8x1xf32>
    %cst_16 = arith.constant 9.99999974E-6 : f32
    %37 = vector.broadcast %cst_16 : f32 to vector<8x1xf32>
    %38 = arith.addf %35, %37 : vector<8x1xf32>
    %39 = math.rsqrt %38 : vector<8x1xf32>
    %40 = arith.mulf %17, %39 : vector<8x1xf32>
    %41 = arith.mulf %36, %40 : vector<8x1xf32>
    %42 = arith.subf %18, %41 : vector<8x1xf32>
    %c0_17 = arith.constant 0 : index
    %c0_18 = arith.constant 0 : index
    %43 = vector.load %arg1[%c0_17, %c0_18] : memref<8x256xf32, #tpu.memory_space<vmem>>, vector<8x256xf32>
    %44 = vector.broadcast %40 : vector<8x1xf32> to vector<8x256xf32>
    %45 = arith.mulf %43, %44 : vector<8x256xf32>
    %46 = vector.broadcast %42 : vector<8x1xf32> to vector<8x256xf32>
    %47 = arith.addf %45, %46 : vector<8x256xf32>
    %c0_19 = arith.constant 0 : index
    %c0_20 = arith.constant 0 : index
    %48 = vector.load %arg3[%c0_19, %c0_20] : memref<8x256xf32, #tpu.memory_space<vmem>>, vector<8x256xf32>
    tpu.vector_store %arg3[%c0_19, %c0_20], %47 {strides = array<i32>} : memref<8x256xf32, #tpu.memory_space<vmem>>, vector<8x256xf32>,
    return
  }
  func.func @transform_0(%arg0: i32) -> (i32, i32) {
    %c0_i32 = arith.constant 0 : i32
    %c0_i32_0 = arith.constant 0 : i32
    return %arg0, %c0_i32 : i32, i32
  }
  func.func @transform_1(%arg0: i32) -> (i32, i32) {
    %c0_i32 = arith.constant 0 : i32
    %c0_i32_0 = arith.constant 0 : i32
    return %arg0, %c0_i32 : i32, i32
  }
  func.func @transform_2(%arg0: i32) -> (i32, i32) {
    %c0_i32 = arith.constant 0 : i32
    %c0_i32_0 = arith.constant 0 : i32
    return %arg0, %c0_i32 : i32, i32
  }
}

</mosaic_0001>

<bundles_post_ra>
// kernel: tpu_custom_call.1
= control target key start
LH: loop header
LB: loop body
LE: loop exit
PB: predicated region body
PF: predicated region fallthrough
CT: control target
= control target key end

     0   :  { %7 = vsyncpa [#allocation3], 0  ;;  %s269_s0 = inlined_call_operand.hbm [shape: f32[8,256], index: 0, kind: input, shape index: {}]   ;;  %s270_s1 = inlined_call_operand.hbm [shape: f32[8,256], index: 1, kind: input, shape index: {}]   ;;  %s271_s2 = inlined_call_operand.hbm [shape: f32[8,256], index: 2, kind: output, shape index: {}]  }
   0x1   :  { %8 = vsyncpa [#allocation6], 0 }
   0x2   :  { %9 = vsyncpa [#allocation4], 0  ;;  %s15_s11 = sshll.u32 %s269_s0, 4  ;;  %s230_s12 = smov [#allocation2]   ;;  %s16_s11 = int_to_ptr.hbm [resolvable:$true] %s15_s11 }
   0x3   :  { %s17_s13 = sshll.u32 %s230_s12, 4  ;;  %s26_s16 = sshll.u32 %s270_s1, 4  ;;  %s18_s13 = int_to_ptr.vmem [resolvable:$true] %s17_s13  ;;  %s27_s16 = int_to_ptr.hbm [resolvable:$true] %s26_s16 }
   0x4   :  { %20 = dma.hbm_to_vmem [thread:$0]  %s16_s11, 256, %s18_s13, [#allocation3]  }
   0x5   :  { %s231_s17 = smov [#allocation5]  }
   0x6   :  { %s28_s18 = sshll.u32 %s231_s17, 4  ;;  %s29_s18 = int_to_ptr.vmem [resolvable:$true] %s28_s18 }
   0x7   :  { %31 = dma.hbm_to_vmem [thread:$0]  %s27_s16, 256, %s29_s18, [#allocation6]  }
   0x8   :  { %224 = dma.done.wait [#allocation3], 256  }
   0x9   :  { %225 = vsyncadd [#allocation3], 4294967040 }
   0xa   :  { %226 = dma.done.wait [#allocation6], 256  }
   0xb   :  { %227 = vsyncadd [#allocation6], 4294967040  ;;  %v232_v0 = vmov 0   ;;  %v255_v1 = vld [vmem:[#allocation5] sm:$0xff]  ;;  %v258_v2 = vld [vmem:[#allocation2] sm:$0xff]  ;;  %s233_s0 = smov [#allocation7]  }
   0xc   :  { %147 = vset.pattern.permute.xlu0 %v232_v0  ;;  %v42_v3 = vld [vmem:[#allocation5 + $0x8] sm:$0xff]  ;;  %v78_v11 = vld [vmem:[#allocation2 + $0x8] sm:$0xff]  ;;  %s130_s1 = sshll.u32 %s233_s0, 4  ;;  %s132_s21 = sshll.u32 %s271_s2, 4  ;;  %s131_s1 = int_to_ptr.vmem [resolvable:$true] %s130_s1  ;;  %s133_s21 = int_to_ptr.hbm [resolvable:$true] %s132_s21 }
   0xd   :  { %45 = vperm.xlu0 %147, %v255_v1  }
  0x15   :  { %81 = vperm.xlu0 %147, %v258_v2  }
  0x7f   :  { %v46_v4 = vpop.permute.xlu0 %45 }
  0x80   :  { %v48_v5 = vsub.f32 %v255_v1, %v46_v4  ;;  %v49_v6 = vsub.f32 %v42_v3, %v46_v4 }
  0x82   :  { %v50_v7 = vadd.f32 %v49_v6, %v48_v5  ;;  %v53_v8 = vmul.f32 %v48_v5, %v48_v5  ;;  %v54_v9 = vmul.f32 %v49_v6, %v49_v6 }
  0x84   :  { %51 = vadd.xlane.f32.xlu1 %v50_v7  ;;  %v55_v10 = vadd.f32 %v54_v9, %v53_v8 }
  0x86   :  { %56 = vadd.xlane.f32.xlu2 %v55_v10 }
  0x87   :  { %v82_v12 = vpop.permute.xlu0 %81 }
  0x88   :  { %v84_v13 = vsub.f32 %v258_v2, %v82_v12  ;;  %v85_v14 = vsub.f32 %v78_v11, %v82_v12 }
  0x8a   :  { %v86_v15 = vadd.f32 %v85_v14, %v84_v13  ;;  %v89_v16 = vmul.f32 %v84_v13, %v84_v13  ;;  %v90_v17 = vmul.f32 %v85_v14, %v85_v14 }
  0x8c   :  { %87 = vadd.xlane.f32.xlu1 %v86_v15  ;;  %v91_v18 = vadd.f32 %v90_v17, %v89_v16 }
  0x8e   :  { %92 = vadd.xlane.f32.xlu2 %v91_v18 }
  0xf7   :  { %v52_v19 = vpop.xlane.xlu1 %51 }
  0xf8   :  { %v58_v20 = vmul.f32 0.00390625, %v52_v19 }
  0xf9   :  { %v57_v21 = vpop.xlane.xlu2 %56 }
  0xfa   :  { %v59_v22 = vmul.f32 %v58_v20, %v52_v19  ;;  %v75_v53 = vadd.f32 %v58_v20, %v255_v1 }
  0xfc   :  { %v60_v23 = vsub.f32 %v57_v21, %v59_v22 }
  0xfe   :  { %v61_v24 = vmax.f32 %v60_v23, 0.0 }
  0xff   :  { %v88_v25 = vpop.xlane.xlu1 %87 }
 0x100   :  { %v62_v26 = vmul.f32 0.003921569, %v61_v24  ;;  %v94_v27 = vmul.f32 0.00390625, %v88_v25 }
 0x101   :  { %v93_v28 = vpop.xlane.xlu2 %92 }
 0x102   :  { %148 = vrsqrt.f32 %v62_v26  ;;  %v96_v29 = vmul.f32 %v94_v27, %v94_v27  ;;  %v95_v30 = vmul.f32 0.00390625, %v93_v28  ;;  %vm70_vm1 = vcmp.eq.f32.partialorder %v62_v26, inf }
 0x103   :  { %v73_v48 = vand.u32 2147483648, %v62_v26  ;;  %vm72_vm4 = vcmp.eq.f32.partialorder %v62_v26, 0.0  ;;  %v99_v51 = vadd.f32 %v94_v27, %v258_v2 }
 0x104   :  { %v97_v31 = vsub.f32 %v95_v30, %v96_v29 }
 0x106   :  { %v98_v32 = vmax.f32 %v97_v31, 0.0 }
 0x108   :  { %v149_v33 = vpop.eup %148  ;;  %v100_v34 = vadd.f32 1e-05, %v98_v32 }
 0x109   :  { %v64_v35 = vmul.f32 %v149_v33, %v62_v26 }
 0x10a   :  { %150 = vrsqrt.f32 %v100_v34  ;;  %vm107_vm2 = vweird.f32 %v100_v34 }
 0x10b   :  { %v65_v36 = vmul.f32 %v149_v33, %v64_v35 }
 0x10d   :  { %v66_v37 = vmul.f32 0.5, %v65_v36 }
 0x10f   :  { %v67_v38 = vsub.f32 1.5, %v66_v37 }
 0x110   :  { %v151_v39 = vpop.eup %150 }
 0x111   :  { %v102_v40 = vmul.f32 %v151_v39, %v100_v34  ;;  %v68_v41 = vmul.f32 %v149_v33, %v67_v38  ;;  %vm108_vm0 = vweird.f32 %v151_v39 }
 0x112   :  { %vm109_vm3 = vmor %vm107_vm2, %vm108_vm0 }
 0x113   :  { %v103_v42 = vmul.f32 %v151_v39, %v102_v40  ;;  %v69_v43 = vmul.f32 %v68_v41, %v62_v26 }
 0x115   :  { %v104_v44 = vmul.f32 0.5, %v103_v42  ;;  %v71_v46 = vsel %vm70_vm1, %v62_v26, %v69_v43 }
 0x116   :  { %v74_v50 = vsel %vm72_vm4, %v73_v48, %v71_v46 }
 0x117   :  { %v105_v45 = vsub.f32 1.5, %v104_v44 }
 0x119   :  { %v106_v47 = vmul.f32 %v151_v39, %v105_v45 }
 0x11b   :  { %v110_v49 = vsel %vm109_vm3, %v151_v39, %v106_v47 }
 0x11c   :  { %v111_v52 = vmul.f32 %v110_v49, %v74_v50 }
 0x11e   :  { %v112_v54 = vmul.f32 %v111_v52, %v99_v51  ;;  %v114_v56 = vmul.f32 %v111_v52, %v258_v2  ;;  %v115_v57 = vmul.f32 %v111_v52, %v78_v11 }
 0x120   :  { %v113_v55 = vsub.f32 %v75_v53, %v112_v54 }
 0x122   :  { %118 = vperm.xlu0 %147, %v113_v55  }
 0x194   :  { %v119_v58 = vpop.permute.xlu0 %118 }
 0x195   :  { %v121_v59 = vadd.f32 %v119_v58, %v114_v56  ;;  %v122_v60 = vadd.f32 %v119_v58, %v115_v57 }
 0x197   :  { %123 = vst [vmem:[#allocation7] sm:$0xff] %v121_v59 }
 0x198   :  { %124 = vst [vmem:[#allocation7 + $0x8] sm:$0xff] %v122_v60 }
 0x199   :  { %135 = dma.vmem_to_hbm [thread:$0]  %s131_s1, 256, %s133_s21, [#allocation4]  }
 0x19a   :  { %228 = dma.done.wait [#allocation4], 256  }
 0x19b   :  { %229 = vsyncadd [#allocation4], 4294967040 }
 0x19c   :  { %140 = vsyncpa [#allocation3], 1 }
 0x19d   :  { %141 = vsyncpa [#allocation6], 1 }
 0x19e   :  { %142 = vsyncpa [#allocation4], 1 }

</bundles_post_ra>
